<compile_context>
chip_gen: v7x
topology: tpu7x:2x2x1
jax: 0.10.0
libtpu: 0.0.40
codegen_flags: <defaults>
</compile_context>

<pallas_src>
import jax
import jax.numpy as jnp
from jax.experimental import pallas as pl
from jax.experimental.pallas import tpu as pltpu

EMB_DIM = 24     # embedding width from the original module
GROUP = 128      # queries handled per grid step (= output lane width)


def _rl_kernel(idx_ref, user_ref, mat_hbm, out_ref, books_buf, copy_sem):
    # idx_ref:   (B_pad,) int32 in SMEM (scalar prefetch)
    # user_ref:  (1, EMB_DIM) f32 in VMEM
    # mat_hbm:   (N, EMB_DIM) f32 raw HBM ref (pl.ANY)
    # out_ref:   (1, GROUP) f32 VMEM output block (lane-dense)
    # books_buf: (GROUP, EMB_DIM) f32 VMEM scratch (gathered rows)
    # copy_sem:  (1,) DMA semaphore shared by all row copies of this step
    g = pl.program_id(0)
    base = g * GROUP

    # Issue all GROUP row-gather DMAs before waiting: many copies in flight
    # hide HBM latency (the gather is descriptor/latency bound, ~96 B per row).
    @pl.loop(0, GROUP)
    def _start(r):
        row = idx_ref[base + r]
        pltpu.make_async_copy(
            mat_hbm.at[pl.ds(row, 1), :],
            books_buf.at[pl.ds(r, 1), :],
            copy_sem.at[0],
        ).start()

    # Wait for all of them (identical byte count per copy, shared semaphore).
    @pl.loop(0, GROUP)
    def _wait(r):
        pltpu.make_async_copy(
            mat_hbm.at[pl.ds(0, 1), :],
            books_buf.at[pl.ds(r, 1), :],
            copy_sem.at[0],
        ).wait()

    # One vectorized dot over the whole tile: (1,24) . (GROUP,24)^T -> (1,GROUP)
    books = books_buf[...]
    logits = jax.lax.dot_general(
        user_ref[...], books,
        dimension_numbers=(((1,), (1,)), ((), ())),
        precision=jax.lax.Precision.HIGHEST,
        preferred_element_type=jnp.float32,
    )
    out_ref[...] = jax.nn.sigmoid(logits)          # (1, GROUP), full-lane store


def rl_model_forward(user_vector, book_indices, matrix):
    """Batched RLModel forward.

    user_vector:  (1, 24) f32 (the nn.Embedding(1, 24) weight)
    book_indices: python int, 0-d, or (B,) int array of rows into `matrix`
    matrix:       (N, 24) f32
    returns:      (B,) f32 = sigmoid(sum(user_vector * matrix[idx], axis=-1))
                  (shape (1,) for a single index, matching the torch module)
    """
    idx = jnp.atleast_1d(jnp.asarray(book_indices, dtype=jnp.int32))
    b = idx.shape[0]
    n_rows = matrix.shape[0]
    idx = jnp.clip(idx, 0, n_rows - 1)            # guard out-of-range gathers

    n_groups = pl.cdiv(b, GROUP)
    b_pad = n_groups * GROUP
    idx_pad = jnp.zeros((b_pad,), jnp.int32).at[:b].set(idx)

    user_vector = jnp.asarray(user_vector, jnp.float32).reshape(1, EMB_DIM)
    matrix = jnp.asarray(matrix, jnp.float32)

    out = pl.pallas_call(
        _rl_kernel,
        out_shape=jax.ShapeDtypeStruct((1, b_pad), jnp.float32),
        grid_spec=pltpu.PrefetchScalarGridSpec(
            num_scalar_prefetch=1,
            grid=(n_groups,),
            in_specs=[
                # user embedding (always the same (1,24) block)
                pl.BlockSpec((1, EMB_DIM), lambda g, idx_ref: (0, 0)),
                # book matrix stays in HBM; rows gathered with manual DMAs
                pl.BlockSpec(memory_space=pl.ANY),
            ],
            out_specs=pl.BlockSpec((1, GROUP), lambda g, idx_ref: (0, g)),
            scratch_shapes=[
                pltpu.VMEM((GROUP, EMB_DIM), jnp.float32),
                pltpu.SemaphoreType.DMA((1,)),
            ],
        ),
        compiler_params=pltpu.CompilerParams(
            dimension_semantics=("parallel",),     # split query groups over TCs (v7x)
        ),
        cost_estimate=pl.CostEstimate(
            flops=2 * EMB_DIM * b_pad,
            transcendentals=b_pad,
            bytes_accessed=b_pad * EMB_DIM * 4 + b_pad * 4 + EMB_DIM * 4 + b_pad * 4,
        ),
    )(idx_pad, user_vector, matrix)

    return out[0, :b]


if __name__ == "__main__":
    key = jax.random.PRNGKey(0)
    k_user, k_mat, k_idx = jax.random.split(key, 3)

    n_books = 16
    # Deterministic "parameters": user_vector is the embedding weight (1, 24).
    user_vector = jax.random.normal(k_user, (1, EMB_DIM), dtype=jnp.float32)
    matrix = jax.random.normal(k_mat, (n_books, EMB_DIM), dtype=jnp.float32)

    # Batched path: 130 queries -> 2 grid steps of 128 (second one padded).
    book_indices = jax.random.randint(k_idx, (130,), 0, n_books, dtype=jnp.int32)
    out_batched = rl_model_forward(user_vector, book_indices, matrix)
    jax.block_until_ready(out_batched)

    # Single-query path (exactly the original torch forward signature).
    out_single = rl_model_forward(user_vector, 3, matrix)
    jax.block_until_ready(out_single)

    # Plain-JAX reference (same math as the torch forward).
    ref_batched = jax.nn.sigmoid(jnp.sum(user_vector * matrix[book_indices], axis=1))
    ref_single = jax.nn.sigmoid(
        jnp.sum(user_vector * matrix[3].reshape(1, EMB_DIM), axis=1))

    assert out_batched.shape == (130,)
    assert out_single.shape == (1,)
    assert jnp.allclose(out_batched, ref_batched, atol=1e-5, rtol=1e-5), (
        out_batched, ref_batched)
    assert jnp.allclose(out_single, ref_single, atol=1e-5, rtol=1e-5), (
        out_single, ref_single)

    print("KERNEL_OK")
</pallas_src>

<mosaic_0001>
module attributes {stable_mosaic.version = 11 : i64} {
  func.func @_rl_kernel(%arg0: i32, %arg1: memref<256xi32, #tpu.memory_space<smem>>, %arg2: memref<1x24xf32, #tpu.memory_space<vmem>>, %arg3: memref<16x24xf32, #tpu.memory_space<any>>, %arg4: memref<1x128xf32, #tpu.memory_space<vmem>>, %arg5: memref<128x24xf32, #tpu.memory_space<vmem>>, %arg6: memref<1x!tpu.dma_semaphore, #tpu.memory_space<semaphore_mem>>) attributes {dimension_semantics = [#tpu.dimension_semantics<parallel>], iteration_bounds = array<i64: 2>, scalar_prefetch = 1 : i64, scratch_operands = 2 : i64, tpu.core_type = #tpu.core_type<tc>, window_params = [{pipeline_mode = #tpu.pipeline_mode<synchronous>, transform_indices = @transform_0, window_bounds = array<i64: 1, 24>}, {}, {transform_indices = @transform_2, window_bounds = array<i64: 1, 128>}]} {
    %c128_i32 = arith.constant 128 : i32
    %0 = arith.muli %arg0, %c128_i32 : i32
    %c0_i32 = arith.constant 0 : i32
    %c128_i32_0 = arith.constant 128 : i32
    %1 = arith.addi %c0_i32, %c128_i32_0 : i32
    %c1_i32 = arith.constant 1 : i32
    scf.for %arg7 = %c0_i32 to %1 step %c1_i32  : i32 {
      %c1_i32_12 = arith.constant 1 : i32
      %12 = arith.muli %arg7, %c1_i32_12 : i32
      %c0_i32_13 = arith.constant 0 : i32
      %13 = arith.addi %c0_i32_13, %12 : i32
      %14 = arith.addi %0, %13 : i32
      %15 = arith.index_cast %14 : i32 to index
      %16 = memref.load %arg1[%15] : memref<256xi32, #tpu.memory_space<smem>>
      %c0_i32_14 = arith.constant 0 : i32
      %c0_i32_15 = arith.constant 0 : i32
      %17 = tpu.memref_slice %arg3[%16, %c0_i32_15] : memref<16x24xf32, #tpu.memory_space<any>> -> memref<1x24xf32, #tpu.memory_space<any>>
      %c0_i32_16 = arith.constant 0 : i32
      %18 = tpu.memref_slice %arg5[%13, %c0_i32_16] : memref<128x24xf32, #tpu.memory_space<vmem>> -> memref<1x24xf32, #tpu.memory_space<vmem>>
      %19 = tpu.memref_slice %arg6[%c0_i32_14] : memref<1x!tpu.dma_semaphore, #tpu.memory_space<semaphore_mem>> -> memref<1x!tpu.dma_semaphore, #tpu.memory_space<semaphore_mem>>
      %20 = tpu.memref_squeeze %19 : memref<1x!tpu.dma_semaphore, #tpu.memory_space<semaphore_mem>> -> memref<!tpu.dma_semaphore, #tpu.memory_space<semaphore_mem>>
      tpu.enqueue_dma source(%17 : memref<1x24xf32, #tpu.memory_space<any>>) target(%18 : memref<1x24xf32, #tpu.memory_space<vmem>>) target_semaphore(%20 : memref<!tpu.dma_semaphore, #tpu.memory_space<semaphore_mem>>)
    }
    %c128_i32_1 = arith.constant 128 : i32
    %c0_i32_2 = arith.constant 0 : i32
    %c128_i32_3 = arith.constant 128 : i32
    %2 = arith.addi %c0_i32_2, %c128_i32_3 : i32
    %c1_i32_4 = arith.constant 1 : i32
    scf.for %arg7 = %c0_i32_2 to %2 step %c1_i32_4  : i32 {
      %c1_i32_12 = arith.constant 1 : i32
      %12 = arith.muli %arg7, %c1_i32_12 : i32
      %c0_i32_13 = arith.constant 0 : i32
      %13 = arith.addi %c0_i32_13, %12 : i32
      %c0_i32_14 = arith.constant 0 : i32
      %c0_i32_15 = arith.constant 0 : i32
      %c0_i32_16 = arith.constant 0 : i32
      %14 = tpu.memref_slice %arg3[%c0_i32_15, %c0_i32_16] : memref<16x24xf32, #tpu.memory_space<any>> -> memref<1x24xf32, #tpu.memory_space<any>>
      %c0_i32_17 = arith.constant 0 : i32
      %15 = tpu.memref_slice %arg5[%13, %c0_i32_17] : memref<128x24xf32, #tpu.memory_space<vmem>> -> memref<1x24xf32, #tpu.memory_space<vmem>>
      %16 = tpu.memref_slice %arg6[%c0_i32_14] : memref<1x!tpu.dma_semaphore, #tpu.memory_space<semaphore_mem>> -> memref<1x!tpu.dma_semaphore, #tpu.memory_space<semaphore_mem>>
      %17 = tpu.memref_squeeze %16 : memref<1x!tpu.dma_semaphore, #tpu.memory_space<semaphore_mem>> -> memref<!tpu.dma_semaphore, #tpu.memory_space<semaphore_mem>>
      tpu.wait_dma2 semaphore(%17 : memref<!tpu.dma_semaphore, #tpu.memory_space<semaphore_mem>>) src(%14 : memref<1x24xf32, #tpu.memory_space<any>>) dst(%15 : memref<1x24xf32, #tpu.memory_space<vmem>>)
    }
    %c128_i32_5 = arith.constant 128 : i32
    %c0 = arith.constant 0 : index
    %c0_6 = arith.constant 0 : index
    %3 = vector.load %arg5[%c0, %c0_6] : memref<128x24xf32, #tpu.memory_space<vmem>>, vector<128x24xf32>
    %c0_7 = arith.constant 0 : index
    %c0_8 = arith.constant 0 : index
    %4 = vector.load %arg2[%c0_7, %c0_8] : memref<1x24xf32, #tpu.memory_space<vmem>>, vector<1x24xf32>
    %cst = arith.constant dense<0.000000e+00> : vector<1x128xf32>
    %5 = tpu.matmul %4, %3, %cst {dimension_numbers = #tpu.dot_dimension_numbers<[1], [1], [0], [0], [0, 0, 1, 0], [], []>, precision = #tpu.contract_precision<fp32>} : vector<1x24xf32>, vector<128x24xf32>, vector<1x128xf32> -> vector<1x128xf32>
    %6 = arith.negf %5 : vector<1x128xf32>
    %7 = math.exp %6 : vector<1x128xf32>
    %cst_9 = arith.constant 1.000000e+00 : f32
    %8 = vector.broadcast %cst_9 : f32 to vector<1x128xf32>
    %9 = arith.addf %8, %7 : vector<1x128xf32>
    %10 = arith.divf %8, %9 : vector<1x128xf32>
    %c0_10 = arith.constant 0 : index
    %c0_11 = arith.constant 0 : index
    %11 = vector.load %arg4[%c0_10, %c0_11] : memref<1x128xf32, #tpu.memory_space<vmem>>, vector<1x128xf32>
    tpu.vector_store %arg4[%c0_10, %c0_11], %10 {strides = array<i32>} : memref<1x128xf32, #tpu.memory_space<vmem>>, vector<1x128xf32>,
    return
  }
  func.func @transform_0(%arg0: i32, %arg1: memref<256xi32, #tpu.memory_space<smem>>) -> (i32, i32) {
    %c0_i32 = arith.constant 0 : i32
    %c0_i32_0 = arith.constant 0 : i32
    %c0_i32_1 = arith.constant 0 : i32
    return %c0_i32, %c0_i32_0 : i32, i32
  }
  func.func @transform_2(%arg0: i32, %arg1: memref<256xi32, #tpu.memory_space<smem>>) -> (i32, i32) {
    %c0_i32 = arith.constant 0 : i32
    %c0_i32_0 = arith.constant 0 : i32
    return %c0_i32, %arg0 : i32, i32
  }
}

</mosaic_0001>

<bundles_post_ra>
// kernel: tpu_custom_call.1
= control target key start
LH: loop header
LB: loop body
LE: loop exit
PB: predicated region body
PF: predicated region fallthrough
CT: control target
= control target key end

     0   :  { %s1978_s0 = inlined_call_operand.hbm [shape: s32[256], index: 0, kind: input, shape index: {}]   ;;  %s1979_s1 = inlined_call_operand.vmem [shape: f32[1,24], index: 1, kind: input, shape index: {}]   ;;  %s1980_s2 = inlined_call_operand.hbm [shape: f32[16,24], index: 2, kind: input, shape index: {}]   ;;  %s1981_s3 = inlined_call_operand.hbm [shape: f32[1,256], index: 3, kind: output, shape index: {}]  }
   0x1   :  { %s1462_s14 = scalar_lea.hbm %s1978_s0, 32 }
   0x2   :  { %p1463_p0 = scmp.ne.s32.totalorder %s1978_s0, %s1462_s14  ;;  %p1466_p1 = scmp.lt.u32.totalorder %s1462_s14, %s1978_s0 }
   0x4   :  { %p1468_p2 = pnand %p1466_p1, %p1463_p0 }
   0x6   :  { %1471 = shalt.err (!%p1468_p2)  }
   0x7   :  { %s1580_s19 = smov [#allocation5]  }
   0x8   :  { %9 = dma.hbm_to_smem %s1978_s0, 32, %s1580_s19, [#allocation4] }
   0x9   :  { %1548 = dma.done.wait [#allocation4], 32 }
   0xa   :  { %1549 = vsyncadd [#allocation4], 4294967264 }
   0xb   :  { %11 = sfence }
   0xc   :  { %12 = vsyncpa [#allocation7], 0 }
   0xd   :  { %14 = vsyncpa [#allocation7 + $0x1], 0  ;;  %s1618_s22 = smov 0   ;;  %s1620_s23 = smov 0  }
   0xe   :  { %s1622_s24 = smov 0   ;;  %s1624_s25 = smov 0  }
   0xf LB: > { %s1639_s0 = sadd.s32 4294967295, %s1570_s25   ;;  %s924_s26 = sadd.s32 4294967294, %s1570_s25   ;;  %s1570_s25 = sphi %s1624_s25, %s1988_s25   ;;  %s1566_s24 = sphi %s1622_s24, %s1987_s24   ;;  %s1562_s23 = sphi %s1620_s23, %s1986_s23   ;;  %s1558_s22 = sphi %s1618_s22, %s1985_s22  }
  0x10   : > { %s1643_s27 = sadd.s32 1, %s1570_s25   ;;  %s48_s28 = sadd.s32 1, %s1566_s24 }
  0x11   : > { %s45_s29 = ssub.s32 %s1570_s25, %s1643_s27  ;;  %p58_p3 = scmp.ne.s32.totalorder %s1566_s24, %s1562_s23 }
  0x12   : > { %p46_p4 = scmp.eq.s32.totalorder %s45_s29, 0  ;;  %p59_p5 = scmp.eq.s32.totalorder %s1639_s0, 1 }
  0x13   : > { %p64_p6 = scmp.ne.s32.totalorder %s1562_s23, %s1558_s22  ;;  %p65_p7 = scmp.eq.s32.totalorder %s924_s26, 1 }
  0x14   : > { %s1654_s30 = scalar_select %p46_p4, %s1566_s24, %s48_s28  }
  0x15   : > { %p1656_p8 = por %p59_p5, %p58_p3  ;;  %p1660_p9 = por %p65_p7, %p64_p6 }
  0x16   : > { %p926_p10 = scmp.ge.s32.totalorder %s1570_s25, 1  ;;  %p86_p11 = scmp.lt.s32.totalorder %s1570_s25, 3 }
  0x17   : > { %s1983_s5 = scalar_select %p1660_p9, 1, 0 }
  0x18   : > { %p87_p12 = pnand %p926_p10, %p86_p11 }
  0x19   : > { %s98_s6 = sand.u32 (!%p87_p12), 1, %s1562_s23   ;;  %s927_s7 = sshll.u32 (!%p87_p12), %s1639_s0, 7 }
  0x1a   : > { %90 = sbr.rel (%p87_p12) target bundleno = 527 (0x20f), region = 24  ;;  %s1670_s8 = scalar_lea.vmem (!%p87_p12), [#allocation6], %s98_s6 }
  0x1b   : > { %s1672_s9 = smov (!%p87_p12), 0  }
  0x21 LB: >> { %s107_s10 = sadd.s32 %s1574_s9, %s927_s7  ;;  %s111_s12 = scalar_lea.vmem [#allocation2], %s1574_s9  ;;  %s1574_s9 = sphi %s1672_s9, %s106_s9  }
  0x22   : >> { %s108_s11 = sld [smem:[#allocation5 + %s107_s10]]  ;;  %s119_s13 = sshll.u32 %s111_s12, 4  ;;  %s120_s13 = int_to_ptr.vmem [resolvable:$true] %s119_s13 }
  0x23   : >> { %s1474_s21 = scalar_lea.hbm %s1980_s2, 256 }
  0x28   : >> { %s928_s14 = sshll.u32 %s108_s11, 4 }
  0x29   : >> { %s110_s17 = scalar_lea.hbm %s1980_s2, %s928_s14 }
  0x2a   : >> { %s1472_s18 = scalar_lea.hbm %s110_s17, 16  ;;  %p1475_p0 = scmp.lt.u32.totalorder %s110_s17, %s1980_s2 }
  0x2b   : >> { %p1473_p13 = scmp.ne.s32.totalorder %s110_s17, %s1472_s18  ;;  %p1476_p1 = scmp.lt.u32.totalorder %s1474_s21, %s1472_s18 }
  0x2c   : >> { %p1478_p3 = scmp.lt.u32.totalorder %s1472_s18, %s110_s17 }
  0x2d   : >> { %p1477_p2 = por %p1476_p1, %p1475_p0 }
  0x2f   : >> { %p1479_p4 = por %p1478_p3, %p1477_p2 }
  0x31   : >> { %p1480_p5 = pnand %p1479_p4, %p1473_p13 }
  0x33   : >> { %1483 = shalt.err (!%p1480_p5)  }
  0x34   : >> { %s1484_s29 = scalar_lea.vmem %s120_s13, 16  ;;  %s1581_s10 = smov [#allocation2]  }
  0x35   : >> { %p1485_p6 = scmp.ne.s32.totalorder %s120_s13, %s1484_s29  ;;  %s1486_s11 = sshll.u32 %s1581_s10, 4  ;;  %s1487_s11 = int_to_ptr.vmem [resolvable:$false] %s1486_s11 }
  0x36   : >> { %s1488_s12 = scalar_lea.vmem %s1487_s11, 2048  ;;  %p1489_p7 = scmp.lt.s32.totalorder %s120_s13, %s1487_s11 }
  0x37   : >> { %p1490_p10 = scmp.lt.s32.totalorder %s1488_s12, %s1484_s29 }
  0x39   : >> { %p1491_p11 = por %p1490_p10, %p1489_p7 }
  0x3b   : >> { %p1492_p12 = pnand %p1491_p11, %p1485_p6 }
  0x3d   : >> { %1495 = shalt.err (!%p1492_p12)  }
  0x3e   : >> { %122 = dma.hbm_to_vmem [thread:$0]  %s110_s17, 16, %s120_s13, [#allocation3] }
  0x3f   : >> { %s106_s9 = sadd.s32 1, %s1574_s9  }
  0x40   : >> { %p103_p9 = scmp.ge.s32.totalorder %s106_s9, 128  }
  0x41   : > { %s1576_s14 = smov (%p103_p9), 0  }
  0x42   : > { %105 = sbr.rel (!%p103_p9) target bundleno = 33 (0x21), region = 76 }
  0x49 LB: >> { %1550 = dma.done.wait [#allocation3], 16  ;;  %s1578_s14 = sphi %s1576_s14, %s128_s14  }
  0x4a   : >> { %1551 = vsyncadd [#allocation3], 4294967280  ;;  %s128_s14 = sadd.s32 1, %s1578_s14  }
  0x4b   : >> { %p125_p13 = scmp.ge.s32.totalorder %s128_s14, 128  }
  0x4c   : > { %v132_v0 = vld [vmem:[#allocation2] sm:$0xff] (%p125_p13)  ;;  %v133_v1 = vld [vmem:[#allocation2 + $0x8] sm:$0xff] (%p125_p13)  ;;  %vm149_vm0 = vcmask (%p125_p13), 195584   ;;  %v134_v2 = vld [vmem:[#allocation2 + $0x10] sm:$0xff] (%p125_p13)  ;;  %v1582_v3 = vmov (%p125_p13), 0.0|0.0   ;;  %vm1583_vm1 = vmmov (%p125_p13), 0  }
  0x4d   : > { %127 = sbr.rel (!%p125_p13) target bundleno = 73 (0x49), region = 87  ;;  %1246 = vmatprep.subr.bf16.mxu1 (%p125_p13), %v1582_v3  ;;  %1318 = vmatprep.subr.bf16.mxu0 (%p125_p13), %v1582_v3  ;;  %v154_v4 = vsel (%p125_p13), %vm149_vm0, %v132_v0, 0  ;;  %v157_v5 = vsel (%p125_p13), %vm149_vm0, %v133_v1, 0  ;;  %v135_v6 = vld [vmem:[#allocation2 + $0x18] sm:$0xff] (%p125_p13)  ;;  %v160_v9 = vsel (%p125_p13), %vm149_vm0, %v134_v2, 0  ;;  %v136_v14 = vld [vmem:[#allocation2 + $0x20] sm:$0xff] (%p125_p13) }
  0x4e   : > { %v202_v7 = vand.u32 (%p125_p13), 4294901760, %v154_v4  ;;  %v205_v8 = vand.u32 (%p125_p13), 4294901760, %v157_v5  ;;  %v163_v10 = vsel (%p125_p13), %vm149_vm0, %v135_v6, 0  ;;  %v208_v12 = vand.u32 (%p125_p13), 4294901760, %v160_v9  ;;  %v137_v15 = vld [vmem:[#allocation2 + $0x28] sm:$0xff] (%p125_p13)  ;;  %v138_v21 = vld [vmem:[#allocation2 + $0x30] sm:$0xff] (%p125_p13) }
  0x4f   : > { %v211_v13 = vand.u32 (%p125_p13), 4294901760, %v163_v10  ;;  %v166_v17 = vsel (%p125_p13), %vm149_vm0, %v136_v14, 0  ;;  %v169_v18 = vsel (%p125_p13), %vm149_vm0, %v137_v15, 0  ;;  %v139_v22 = vld [vmem:[#allocation2 + $0x38] sm:$0xff] (%p125_p13)  ;;  %v1584_v23 = vmov (%p125_p13), 0.0   ;;  %v140_v29 = vld [vmem:[#allocation2 + $0x40] sm:$0xff] (%p125_p13) }
  0x50   : > { %v1699_v11 = vpack.c.bf16 (%p125_p13), %v205_v8, %v202_v7  ;;  %v214_v19 = vand.u32 (%p125_p13), 4294901760, %v166_v17  ;;  %v217_v20 = vand.u32 (%p125_p13), 4294901760, %v169_v18  ;;  %1068 = vmatprep.mubr.msk.f32.mxu1 (%p125_p13), %vm1583_vm1, %v1584_v23  ;;  %1173 = vmatprep.mubr.msk.f32.mxu0 (%p125_p13), %vm1583_vm1, %v1584_v23  ;;  %v172_v25 = vsel (%p125_p13), %vm149_vm0, %v138_v21, 0  ;;  %v141_v30 = vld [vmem:[#allocation2 + $0x48] sm:$0xff] (%p125_p13)  ;;  %v142_v43 = vld [vmem:[#allocation2 + $0x50] sm:$0xff] (%p125_p13)  ;;  %v143_v44 = vld [vmem:[#allocation2 + $0x58] sm:$0xff] (%p125_p13) }
  0x51   : > { %v1705_v16 = vpack.c.bf16 (%p125_p13), %v211_v13, %v208_v12  ;;  %v175_v26 = vsel (%p125_p13), %vm149_vm0, %v139_v22, 0  ;;  %v220_v27 = vand.u32 (%p125_p13), 4294901760, %v172_v25  ;;  %v178_v31 = vsel (%p125_p13), %vm149_vm0, %v140_v29, 0  ;;  %v144_v60 = vld [vmem:[#allocation2 + $0x60] sm:$0xff] (%p125_p13)  ;;  %v145_v61 = vld [vmem:[#allocation2 + $0x68] sm:$0xff] (%p125_p13)  ;;  %s930_s13 = sshll.u32 (%p125_p13), %s1639_s0, 4 }
  0x52   : > { %1248 = vmatpush3.bf16.xpose.msra.mxu1 (%p125_p13), %v1699_v11  ;;  %1320 = vmatpush3.bf16.xpose.msra.mxu0 (%p125_p13), %v1699_v11  ;;  %v1717_v24 = vpack.c.bf16 (%p125_p13), %v217_v20, %v214_v19  ;;  %v223_v28 = vand.u32 (%p125_p13), 4294901760, %v175_v26  ;;  %v181_v33 = vsel (%p125_p13), %vm149_vm0, %v141_v30, 0  ;;  %v1729_v34 = vsub.f32 (%p125_p13), %v154_v4, %v202_v7  ;;  %s862_s15 = sshll.u32 (%p125_p13), %s1670_s8, 4  ;;  %s1933_s18 = scalar_lea.hbm (%p125_p13), %s1981_s3, %s930_s13  ;;  %s1935_s15 = int_to_ptr.vmem [resolvable:$true] %s862_s15 }
  0x53   : > { %1249 = vmatprep.subr.bf16.mxu1 (%p125_p13), %v1582_v3  ;;  %1321 = vmatprep.subr.bf16.mxu0 (%p125_p13), %v1582_v3  ;;  %v1731_v35 = vsub.f32 (%p125_p13), %v157_v5, %v205_v8  ;;  %v1733_v36 = vsub.f32 (%p125_p13), %v160_v9, %v208_v12  ;;  %v1735_v37 = vsub.f32 (%p125_p13), %v163_v10, %v211_v13  ;;  %v226_v38 = vand.u32 (%p125_p13), 4294901760, %v178_v31  ;;  %v148_v5 = vld [vmem:[%s1979_s1] sm:$0x1] (%p125_p13)  ;;  %v146_v8 = vld [vmem:[#allocation2 + $0x70] sm:$0xff] (%p125_p13)  ;;  %v147_v9 = vld [vmem:[#allocation2 + $0x78] sm:$0xff] (%p125_p13)  ;;  %s850_s19 = scalar_lea.sflag (%p125_p13), [#allocation7], %s98_s6 }
  0x54   : > { %v1726_v32 = vpack.c.bf16 %v223_v28, %v220_v27  ;;  %v1737_v39 = vsub.f32 %v166_v17, %v214_v19  ;;  %v1739_v40 = vsub.f32 %v169_v18, %v217_v20  ;;  %v1741_v41 = vsub.f32 %v172_v25, %v220_v27  ;;  %s1496_s20 = scalar_lea.vmem %s1935_s15, 16  ;;  %s1585_s0 = smov [#allocation6]  }
  0x55   : > { %v229_v42 = vand.u32 4294901760, %v181_v33  ;;  %v1744_v45 = vsub.f32 %v175_v26, %v223_v28  ;;  %v1747_v46 = vsub.f32 %v178_v31, %v226_v38  ;;  %v1295_v47 = vpack.c.bf16 %v1731_v35, %v1729_v34  ;;  %p1497_p9 = scmp.ne.s32.totalorder %s1935_s15, %s1496_s20  ;;  %s1500_s21 = sshll.u32 %s1585_s0, 4  ;;  %s1501_s21 = int_to_ptr.vmem [resolvable:$false] %s1500_s21 }
  0x56   : > { %v1298_v49 = vpack.c.bf16 %v1735_v37, %v1733_v36  ;;  %v1301_v50 = vpack.c.bf16 %v1739_v40, %v1737_v39  ;;  %v184_v51 = vsel %vm149_vm0, %v142_v43, 0  ;;  %v187_v52 = vsel %vm149_vm0, %v143_v44, 0  ;;  %s1502_s26 = scalar_lea.vmem %s1501_s21, 32  ;;  %p1503_p2 = scmp.lt.s32.totalorder %s1935_s15, %s1501_s21 }
  0x57   : > { %v1753_v48 = vsub.f32 %v181_v33, %v229_v42  ;;  %v1304_v53 = vpack.c.bf16 %v1744_v45, %v1741_v41  ;;  %v1765_v55 = vpack.c.bf16 %v229_v42, %v226_v38  ;;  %v232_v56 = vand.u32 4294901760, %v184_v51  ;;  %p1498_p0 = pnand %p1497_p9, %p1656_p8  ;;  %p1504_p3 = scmp.lt.s32.totalorder %s1502_s26, %s1496_s20 }
  0x58   : > { %v235_v57 = vand.u32 4294901760, %v187_v52  ;;  %v190_v63 = vsel %vm149_vm0, %v144_v60, 0  ;;  %v193_v0 = vsel %vm149_vm0, %v145_v61, 0  ;;  %v151_v10 = vsel %vm149_vm0, %v148_v5, 0 }
  0x59   : > { %v1307_v54 = vpack.c.bf16 %v1753_v48, %v1747_v46  ;;  %v1767_v58 = vsub.f32 %v184_v51, %v232_v56  ;;  %v238_v2 = vand.u32 4294901760, %v190_v63  ;;  %v241_v4 = vand.u32 4294901760, %v193_v0  ;;  %p1499_p1 = pneg %p1498_p0  ;;  %p1505_p4 = por %p1504_p3, %p1503_p2 }
  0x5a   : > { %1251 = vmatpush3.bf16.xpose.msra.mxu1 %v1705_v16  ;;  %1323 = vmatpush3.bf16.xpose.msra.mxu0 %v1705_v16  ;;  %v1769_v59 = vsub.f32 %v187_v52, %v235_v57  ;;  %v1779_v1 = vpack.c.bf16 %v235_v57, %v232_v56  ;;  %v196_v13 = vsel %vm149_vm0, %v146_v8, 0  ;;  %v199_v14 = vsel %vm149_vm0, %v147_v9, 0 }
  0x5b   : > { %1252 = vmatprep.subr.bf16.mxu1 %v1582_v3  ;;  %1324 = vmatprep.subr.bf16.mxu0 %v1582_v3  ;;  %v1784_v6 = vsub.f32 %v190_v63, %v238_v2  ;;  %v1786_v7 = vsub.f32 %v193_v0, %v241_v4  ;;  %v1797_v15 = vand.u32 4294901760, %v151_v10  ;;  %v1799_v17 = vpack.c.bf16 %v241_v4, %v238_v2  ;;  %p1506_p5 = pnand %p1505_p4, %p1499_p1 }
  0x5c   : > { %v1310_v62 = vpack.c.bf16 %v1769_v59, %v1767_v58  ;;  %v244_v18 = vand.u32 4294901760, %v196_v13  ;;  %v247_v19 = vand.u32 4294901760, %v199_v14  ;;  %v295_v25 = vand.u32 4294901760, %v1729_v34 }
  0x5d   : > { %v1313_v12 = vpack.c.bf16 %v1786_v7, %v1784_v6  ;;  %v1806_v22 = vsub.f32 %v151_v10, %v1797_v15  ;;  %v302_v26 = vand.u32 4294901760, %v1731_v35  ;;  %v309_v43 = vand.u32 4294901760, %v1733_v36 }
  0x5e   : > { %v1801_v20 = vsub.f32 %v196_v13, %v244_v18  ;;  %v1803_v21 = vsub.f32 %v199_v14, %v247_v19  ;;  %v1817_v29 = vpack.c.bf16 %v247_v19, %v244_v18  ;;  %v296_v30 = vsub.f32 %v1729_v34, %v295_v25 }
  0x5f   : > { %v284_v28 = vand.u32 4294901760, %v1806_v22  ;;  %v303_v31 = vsub.f32 %v1731_v35, %v302_v26  ;;  %v316_v44 = vand.u32 4294901760, %v1735_v37  ;;  %v1343_v56 = vpack.c.bf16 %v302_v26, %v295_v25 }
  0x60   : > { %v1316_v27 = vpack.c.bf16 %v1803_v21, %v1801_v20  ;;  %v297_v38 = vand.u32 4294901760, %v296_v30  ;;  %v310_v57 = vsub.f32 %v1733_v36, %v309_v43  ;;  %v323_v0 = vand.u32 4294901760, %v1737_v39 }
  0x61   : > { %v285_v33 = vsub.f32 %v1806_v22, %v284_v28  ;;  %v304_v42 = vand.u32 4294901760, %v303_v31  ;;  %v317_v60 = vsub.f32 %v1735_v37, %v316_v44  ;;  %v330_v2 = vand.u32 4294901760, %v1739_v40 }
  0x62   : > { %1254 = vmatpush3.bf16.xpose.msra.mxu1 %v1717_v24  ;;  %1326 = vmatpush3.bf16.xpose.msra.mxu0 %v1717_v24  ;;  %v311_v61 = vand.u32 4294901760, %v310_v57  ;;  %v1346_v5 = vpack.c.bf16 %v316_v44, %v309_v43  ;;  %v324_v8 = vsub.f32 %v1737_v39, %v323_v0  ;;  %v337_v14 = vand.u32 4294901760, %v1741_v41 }
  0x63   : > { %1255 = vmatprep.subr.bf16.mxu1 %v1582_v3  ;;  %1327 = vmatprep.subr.bf16.mxu0 %v1582_v3  ;;  %v286_v51 = vand.u32 4294901760, %v285_v33  ;;  %v1271_v52 = vpack.c.bf16 %v304_v42, %v297_v38  ;;  %v318_v63 = vand.u32 4294901760, %v317_v60  ;;  %v331_v9 = vsub.f32 %v1739_v40, %v330_v2 }
  0x64   : > { %v325_v10 = vand.u32 4294901760, %v324_v8  ;;  %v344_v18 = vand.u32 4294901760, %v1744_v45  ;;  %v1349_v25 = vpack.c.bf16 %v330_v2, %v323_v0  ;;  %v338_v26 = vsub.f32 %v1741_v41, %v337_v14 }
  0x65   : > { %v1274_v4 = vpack.c.bf16 %v318_v63, %v311_v61  ;;  %v332_v13 = vand.u32 4294901760, %v331_v9  ;;  %v351_v33 = vand.u32 4294901760, %v1747_v46  ;;  %v358_v38 = vand.u32 4294901760, %v1753_v48 }
  0x66   : > { %v339_v30 = vand.u32 4294901760, %v338_v26  ;;  %v1352_v43 = vpack.c.bf16 %v344_v18, %v337_v14  ;;  %v365_v57 = vand.u32 4294901760, %v1767_v58  ;;  %v372_v60 = vand.u32 4294901760, %v1769_v59 }
  0x67   : > { %v1277_v19 = vpack.c.bf16 %v332_v13, %v325_v10  ;;  %v352_v44 = vsub.f32 %v1747_v46, %v351_v33  ;;  %v1355_v63 = vpack.c.bf16 %v358_v38, %v351_v33  ;;  %v379_v8 = vand.u32 4294901760, %v1784_v6 }
  0x68   : > { %v366_v0 = vsub.f32 %v1767_v58, %v365_v57  ;;  %v373_v2 = vsub.f32 %v1769_v59, %v372_v60  ;;  %v386_v9 = vand.u32 4294901760, %v1786_v7  ;;  %v1358_v13 = vpack.c.bf16 %v372_v60, %v365_v57 }
  0x69   : > { %v380_v14 = vsub.f32 %v1784_v6, %v379_v8  ;;  %v393_v26 = vand.u32 4294901760, %v1801_v20 }
  0x6a   : > { %1257 = vmatpush3.bf16.xpose.msra.mxu1 %v1726_v32  ;;  %1329 = vmatpush3.bf16.xpose.msra.mxu0 %v1726_v32 }
  0x6b   : > { %1258 = vmatprep.subr.bf16.mxu1 %v1582_v3  ;;  %1330 = vmatprep.subr.bf16.mxu0 %v1582_v3  ;;  %v394_v33 = vsub.f32 %v1801_v20, %v393_v26 }
  0x72   : > { %1260 = vmatpush3.bf16.xpose.msra.mxu1 %v1765_v55  ;;  %1332 = vmatpush3.bf16.xpose.msra.mxu0 %v1765_v55 }
  0x73   : > { %1261 = vmatprep.subr.bf16.mxu1 %v1582_v3  ;;  %1333 = vmatprep.subr.bf16.mxu0 %v1582_v3 }
  0x7a   : > { %1263 = vmatpush3.bf16.xpose.msra.mxu1 %v1779_v1  ;;  %1335 = vmatpush3.bf16.xpose.msra.mxu0 %v1779_v1 }
  0x7b   : > { %1264 = vmatprep.subr.bf16.mxu1 %v1582_v3  ;;  %1336 = vmatprep.subr.bf16.mxu0 %v1582_v3 }
  0x82   : > { %1266 = vmatpush3.bf16.xpose.msra.mxu1 %v1799_v17  ;;  %1338 = vmatpush3.bf16.xpose.msra.mxu0 %v1799_v17 }
  0x83   : > { %1267 = vmatprep.subr.bf16.mxu1 %v1582_v3  ;;  %1339 = vmatprep.subr.bf16.mxu0 %v1582_v3 }
  0x8a   : > { %1269 = vmatpush3.bf16.xpose.msra.mxu1 %v1817_v29  ;;  %1341 = vmatpush3.bf16.xpose.msra.mxu0 %v1817_v29 }
  0x8b   : > { %1270 = vmatprep.subr.bf16.mxu1 %v1582_v3  ;;  %1342 = vmatprep.subr.bf16.mxu0 %v1582_v3 }
  0x91   : > { %1069 = vmatmul.mubr.f32.vlgmr.msra.gmra.mrb[0].mxu1 %v286_v51  ;;  %1174 = vmatmul.mubr.f32.vlgmr.msra.gmra.mrb[0].mxu0 %v284_v28  ;;  %v345_v28 = vsub.f32 %v1744_v45, %v344_v18  ;;  %v359_v51 = vsub.f32 %v1753_v48, %v358_v38  ;;  %v387_v18 = vsub.f32 %v1786_v7, %v386_v9 }
  0x92   : > { %1272 = vmatpush3.bf16.xpose.msra.mxu1 %v1271_v52  ;;  %1344 = vmatpush3.bf16.xpose.msra.mxu0 %v1343_v56  ;;  %v353_v52 = vand.u32 4294901760, %v352_v44 }
  0x93   : > { %1273 = vmatprep.subr.bf16.mxu1 %v1582_v3  ;;  %1345 = vmatprep.subr.bf16.mxu0 %v1582_v3  ;;  %v346_v31 = vand.u32 4294901760, %v345_v28  ;;  %v360_v56 = vand.u32 4294901760, %v359_v51  ;;  %v400_v28 = vand.u32 4294901760, %v1803_v21 }
  0x94   : > { %1103 = vmatprep.mubr.msk.f32.mxu1 %vm1583_vm1, %v1584_v23  ;;  %1208 = vmatprep.mubr.msk.f32.mxu0 %vm1583_vm1, %v1584_v23 }
  0x95   : > { %v1280_v42 = vpack.c.bf16 %v346_v31, %v339_v30  ;;  %v1283_v61 = vpack.c.bf16 %v360_v56, %v353_v52  ;;  %v1361_v31 = vpack.c.bf16 %v386_v9, %v379_v8  ;;  %v401_v38 = vsub.f32 %v1803_v21, %v400_v28 }
  0x96   : > { %v1364_v51 = vpack.c.bf16 %v400_v28, %v393_v26 }
  0x9a   : > { %1275 = vmatpush3.bf16.xpose.msra.mxu1 %v1274_v4  ;;  %1347 = vmatpush3.bf16.xpose.msra.mxu0 %v1346_v5  ;;  %v367_v4 = vand.u32 4294901760, %v366_v0  ;;  %v374_v5 = vand.u32 4294901760, %v373_v2 }
  0x9b   : > { %1276 = vmatprep.subr.bf16.mxu1 %v1582_v3  ;;  %1348 = vmatprep.subr.bf16.mxu0 %v1582_v3 }
  0x9c   : > { %v1286_v10 = vpack.c.bf16 %v374_v5, %v367_v4 }
  0xa2   : > { %1278 = vmatpush3.bf16.xpose.msra.mxu1 %v1277_v19  ;;  %1350 = vmatpush3.bf16.xpose.msra.mxu0 %v1349_v25  ;;  %v381_v19 = vand.u32 4294901760, %v380_v14  ;;  %v388_v25 = vand.u32 4294901760, %v387_v18 }
  0xa3   : > { %1279 = vmatprep.subr.bf16.mxu1 %v1582_v3  ;;  %1351 = vmatprep.subr.bf16.mxu0 %v1582_v3 }
  0xa4   : > { %v1289_v30 = vpack.c.bf16 %v388_v25, %v381_v19 }
  0xaa   : > { %1281 = vmatpush3.bf16.xpose.msra.mxu1 %v1280_v42  ;;  %1353 = vmatpush3.bf16.xpose.msra.mxu0 %v1352_v43  ;;  %v395_v42 = vand.u32 4294901760, %v394_v33  ;;  %v402_v43 = vand.u32 4294901760, %v401_v38 }
  0xab   : > { %1282 = vmatprep.subr.bf16.mxu1 %v1582_v3  ;;  %1354 = vmatprep.subr.bf16.mxu0 %v1582_v3 }
  0xac   : > { %v1292_v44 = vpack.c.bf16 %v402_v43, %v395_v42 }
  0xb2   : > { %1284 = vmatpush3.bf16.xpose.msra.mxu1 %v1283_v61  ;;  %1356 = vmatpush3.bf16.xpose.msra.mxu0 %v1355_v63 }
  0xb3   : > { %1285 = vmatprep.subr.bf16.mxu1 %v1582_v3  ;;  %1357 = vmatprep.subr.bf16.mxu0 %v1582_v3 }
  0xba   : > { %1287 = vmatpush3.bf16.xpose.msra.mxu1 %v1286_v10  ;;  %1359 = vmatpush3.bf16.xpose.msra.mxu0 %v1358_v13 }
  0xbb   : > { %1288 = vmatprep.subr.bf16.mxu1 %v1582_v3  ;;  %1360 = vmatprep.subr.bf16.mxu0 %v1582_v3 }
  0xc2   : > { %1290 = vmatpush3.bf16.xpose.msra.mxu1 %v1289_v30  ;;  %1362 = vmatpush3.bf16.xpose.msra.mxu0 %v1361_v31 }
  0xc3   : > { %1291 = vmatprep.subr.bf16.mxu1 %v1582_v3  ;;  %1363 = vmatprep.subr.bf16.mxu0 %v1582_v3 }
  0xca   : > { %1293 = vmatpush3.bf16.xpose.msra.mxu1 %v1292_v44  ;;  %1365 = vmatpush3.bf16.xpose.msra.mxu0 %v1364_v51 }
  0xcb   : > { %1294 = vmatprep.subr.bf16.mxu1 %v1582_v3  ;;  %1366 = vmatprep.subr.bf16.mxu0 %v1582_v3 }
  0xd1   : > { %1104 = vmatmul.mubr.f32.vlgmr.msra.gmra.mrb[0].mxu1 %v1797_v15  ;;  %1209 = vmatmul.mubr.f32.vlgmr.msra.gmra.mrb[0].mxu0 %v1797_v15 }
  0xd2   : > { %1296 = vmatpush3.bf16.xpose.msra.mxu1 %v1295_v47  ;;  %1368 = vmatpush3.bf16.xpose.msra.mxu0 %v1699_v11 }
  0xd3   : > { %1297 = vmatprep.subr.bf16.mxu1 %v1582_v3  ;;  %1369 = vmatprep.subr.bf16.mxu0 %v1582_v3 }
  0xd4   : > { %1138 = vmatprep.mubr.msk.f32.mxu1 %vm1583_vm1, %v1584_v23  ;;  %1243 = vmatprep.mubr.msk.f32.mxu0 %vm1583_vm1, %v1584_v23 }
  0xda   : > { %1299 = vmatpush3.bf16.xpose.msra.mxu1 %v1298_v49  ;;  %1371 = vmatpush3.bf16.xpose.msra.mxu0 %v1705_v16 }
  0xdb   : > { %1300 = vmatprep.subr.bf16.mxu1 %v1582_v3  ;;  %1372 = vmatprep.subr.bf16.mxu0 %v1582_v3 }
  0xe2   : > { %1302 = vmatpush3.bf16.xpose.msra.mxu1 %v1301_v50  ;;  %1374 = vmatpush3.bf16.xpose.msra.mxu0 %v1717_v24 }
  0xe3   : > { %1303 = vmatprep.subr.bf16.mxu1 %v1582_v3  ;;  %1375 = vmatprep.subr.bf16.mxu0 %v1582_v3 }
  0xea   : > { %1305 = vmatpush3.bf16.xpose.msra.mxu1 %v1304_v53  ;;  %1377 = vmatpush3.bf16.xpose.msra.mxu0 %v1726_v32 }
  0xeb   : > { %1306 = vmatprep.subr.bf16.mxu1 %v1582_v3  ;;  %1378 = vmatprep.subr.bf16.mxu0 %v1582_v3 }
  0xf2   : > { %1308 = vmatpush3.bf16.xpose.msra.mxu1 %v1307_v54  ;;  %1380 = vmatpush3.bf16.xpose.msra.mxu0 %v1765_v55 }
  0xf3   : > { %1309 = vmatprep.subr.bf16.mxu1 %v1582_v3  ;;  %1381 = vmatprep.subr.bf16.mxu0 %v1582_v3 }
  0xfa   : > { %1311 = vmatpush3.bf16.xpose.msra.mxu1 %v1310_v62  ;;  %1383 = vmatpush3.bf16.xpose.msra.mxu0 %v1779_v1 }
  0xfb   : > { %1312 = vmatprep.subr.bf16.mxu1 %v1582_v3  ;;  %1384 = vmatprep.subr.bf16.mxu0 %v1582_v3 }
 0x102   : > { %1314 = vmatpush3.bf16.xpose.msra.mxu1 %v1313_v12  ;;  %1386 = vmatpush3.bf16.xpose.msra.mxu0 %v1799_v17 }
 0x103   : > { %1315 = vmatprep.subr.bf16.mxu1 %v1582_v3  ;;  %1387 = vmatprep.subr.bf16.mxu0 %v1582_v3 }
 0x10a   : > { %1317 = vmatpush3.bf16.xpose.msra.mxu1 %v1316_v27  ;;  %1389 = vmatpush3.bf16.xpose.msra.mxu0 %v1817_v29 }
 0x111   : > { %1139 = vmatmul.mubr.f32.vlgmr.msra.gmra.mrb[0].mxu1 %v1806_v22  ;;  %1244 = vmatmul.mubr.f32.vlgmr.msra.gmra.mrb[0].mxu0 %v1797_v15 }
 0x1e4   : > { %v543_v11 = vpop.f32.mrb[0].mxu1  ;;  %v838_v16 = vpop.f32.mrb[0].mxu0 }
 0x1e5   : > { %v1390_v23 = vadd.f32 %v838_v16, %v543_v11  ;;  %v1140_v24 = vpop.f32.mrb[1].mxu1  ;;  %v1245_v32 = vpop.f32.mrb[1].mxu0 }
 0x1e7   : > { %v929_v3 = vmul.f32 -1.442695, %v1390_v23 }
 0x1e9   : > { %1458 = vpow2.f32 %v929_v3 }
 0x1f3   : > { %v1459_v34 = vpop.eup %1458 }
 0x1f4   : > { %v845_v35 = vadd.f32 1.0, %v1459_v34 }
 0x1f6   : > { %1460 = vrcp.f32 %v845_v35 }
 0x200   : > { %v1461_v36 = vpop.eup %1460 }
 0x201   : > { %848 = vst [vmem:[%s1670_s8] sm:$0x1] %v1461_v36 }
 0x202   : > { %1509 = shalt.err (!%p1506_p5)
}
 0x203   : > { %s1510_s6 = scalar_lea.hbm %s1933_s18, 16  ;;  %s1514_s29 = scalar_lea.hbm %s1981_s3, 32 }
 0x204   : > { %p1511_p6 = scmp.ne.s32.totalorder %s1933_s18, %s1510_s6  ;;  %p1515_p11 = scmp.lt.u32.totalorder %s1933_s18, %s1981_s3 }
 0x205   : > { %p1516_p12 = scmp.lt.u32.totalorder %s1514_s29, %s1510_s6  ;;  %p1518_p9 = scmp.lt.u32.totalorder %s1510_s6, %s1933_s18 }
 0x206   : > { %p1512_p7 = pnand %p1511_p6, %p1656_p8 }
 0x207   : > { %p1517_p13 = por %p1516_p12, %p1515_p11 }
 0x208   : > { %p1513_p10 = pneg %p1512_p7 }
 0x209   : > { %p1519_p0 = por %p1518_p9, %p1517_p13 }
 0x20b   : > { %p1520_p1 = pnand %p1519_p0, %p1513_p10 }
 0x20d   : > { %1523 = shalt.err (!%p1520_p1)
}
 0x20e   : > { %1399 = dma.vmem_to_hbm [thread:$0]  (%p1656_p8), %s1935_s15, 16, %s1933_s18, %s850_s19  }
 0x20f PF: > { %p1405_p2 = scmp.ge.s32.totalorder %s1570_s25, 2  ;;  %s874_s12 = sand.u32 1, %s1558_s22  }
 0x210   : > { %p1984_p3 = scmp.ne.s32.totalorder %s1983_s5, 0  ;;  %s875_s14 = scalar_lea.sflag [#allocation7], %s874_s12 }
 0x212   : > { %p1402_p4 = pnand %p1405_p2, %p1984_p3 }
 0x214   : > { %1553 = dma.done.wait (!%p1402_p4), %s875_s14, 16  }
 0x215   : > { %1555 = vsyncadd (!%p1402_p4), %s875_s14, 4294967280  ;;  %p17_p5 = scmp.ge.s32.totalorder %s1643_s27, 4   ;;  %s1985_s22 = smov %s1562_s23 }
 0x216   : > { %s1986_s23 = smov %s1566_s24  ;;  %s1987_s24 = smov %s1654_s30 }
 0x217   : > { %s1988_s25 = smov %s1643_s27  ;;  %19 = sbr.rel (!%p17_p5) target bundleno = 15 (0xf), region = 98 }
 0x21e   :  { %879 = vsyncpa [#allocation7], 1 }
 0x21f   :  { %881 = vsyncpa [#allocation7 + $0x1], 1 }
 0x220   :  { %882 = vsyncmov [#allocation3] }
 0x223   :  { %s883_s25 = vpop.sfrf %882 }
 0x224   :  { %p933_p8 = scmp.ne.s32.totalorder %s883_s25, 0 }
 0x226   :  { %887 = shalt.err (%p933_p8)  }

</bundles_post_ra>
